<compile_context>
chip_gen: v7x
topology: tpu7x:2x2x1
jax: 0.10.0
libtpu: 0.0.40
codegen_flags: <defaults>
</compile_context>

<pallas_src>
import functools
import math

import jax
import jax.numpy as jnp
from jax.experimental import pallas as pl
from jax.experimental.pallas import tpu as pltpu

N_LAYERS = 5      # h1..h5
D_PAD = 128       # lane-aligned padded feature width (covers n_input, n_features, n_output)
BLOCK_B = 512     # batch tile for the gridded path (amortizes per-step overhead)


def _round_up(n, m):
    return ((n + m - 1) // m) * m


def _act_dtype_for_device():
    """bf16 activations on v6e/v7x (native bf16 VPU); f32 on v5e and anything unknown."""
    try:
        kind = jax.devices()[0].device_kind.lower()
    except Exception:
        return jnp.float32
    if ("v6" in kind) or ("v7" in kind) or ("7x" in kind):
        return jnp.bfloat16
    return jnp.float32


# ----------------------------------------------------------------------------
# Kernels
# ----------------------------------------------------------------------------
def _mlp_body(x_bf16, w_ref, b_ref, act_dtype):
    """Shared 5-layer MLP body on full 128x128 padded tiles.

    x_bf16 : (Bb, 128) bf16 (zero-padded); returns q padded to (Bb, 128) f32.
    """
    zero = jnp.asarray(0, act_dtype)
    h = x_bf16
    for i in range(N_LAYERS - 1):
        acc = jnp.dot(h, w_ref[i], preferred_element_type=jnp.float32)
        b = b_ref[i].astype(act_dtype)                       # (1, 128)
        h = jnp.maximum(acc.astype(act_dtype) + b, zero)     # bias+ReLU in act_dtype
        h = h.astype(jnp.bfloat16)                           # no-op when act_dtype=bf16
    q = jnp.dot(h, w_ref[N_LAYERS - 1], preferred_element_type=jnp.float32)
    return q + b_ref[N_LAYERS - 1]                           # (Bb, 128) f32


def _mlp_q_kernel(x_ref, w_ref, b_ref, out_ref, *, act_dtype):
    # Lane-dense full-width store; wrapper slices [:, :n_output].
    out_ref[...] = _mlp_body(x_ref[...], w_ref, b_ref, act_dtype)


def _mlp_qa_kernel(x_ref, a_ref, w_ref, b_ref, out_ref, *, act_dtype):
    q = _mlp_body(x_ref[...], w_ref, b_ref, act_dtype)       # (Bb, 128) f32
    # Fused gather: one-hot select on the lane axis + lane reduce.
    # (action >= n_output selects a zero-padded column -> 0.0, not an error.)
    col = jax.lax.broadcasted_iota(jnp.int32, q.shape, 1)    # (Bb, 128)
    sel = jnp.where(col == a_ref[...], q, 0.0)
    gathered = jnp.sum(sel, axis=1, keepdims=True)           # (Bb, 1)
    # Lane-dense store (broadcast across lanes); wrapper reads column 0.
    out_ref[...] = jnp.broadcast_to(gathered, q.shape)


# ----------------------------------------------------------------------------
# One-time parameter packing (hoisted out of the forward path)
# ----------------------------------------------------------------------------
def pack_params(params, n_input, n_features, n_output):
    """PyTorch-layout params ('w1'..'w5' (out,in), 'b1'..'b5' (out,)) ->
    (w_slab bf16 (5,128,128)  already transposed to (in,out),
     b_slab f32  (5,1,128)),  zero padded (pad is inert)."""
    dims = [n_input] + [n_features] * 4 + [n_output]
    assert max(dims) <= D_PAD, "feature widths must fit in one 128-lane tile"
    w_slab = jnp.zeros((N_LAYERS, D_PAD, D_PAD), jnp.bfloat16)
    b_slab = jnp.zeros((N_LAYERS, 1, D_PAD), jnp.float32)
    for i in range(N_LAYERS):
        w_t = jnp.asarray(params[f"w{i+1}"], jnp.float32).T      # (in, out)
        b = jnp.asarray(params[f"b{i+1}"], jnp.float32)
        w_slab = w_slab.at[i, :dims[i], :dims[i + 1]].set(w_t.astype(jnp.bfloat16))
        b_slab = b_slab.at[i, 0, :dims[i + 1]].set(b)
    return w_slab, b_slab


# ----------------------------------------------------------------------------
# Forward wrapper
# ----------------------------------------------------------------------------
def network_q2_forward(state, packed, *, n_input, n_output, action=None,
                       block_b=BLOCK_B, act_dtype=None):
    """state : (B, 1, n_input) or (B, n_input); packed = pack_params(...) output.
    action : optional (B, 1) int -> returns gathered q values (squeezed)."""
    w_slab, b_slab = packed
    if act_dtype is None:
        act_dtype = _act_dtype_for_device()

    x = jnp.squeeze(state, axis=1) if state.ndim == 3 else state   # torch.squeeze(state, 1)
    B = x.shape[0]

    # Unified cdiv grid: batch is padded to a multiple of the batch tile; the padded
    # rows are zeros (inert) and are sliced away below.
    bb = min(block_b, _round_up(B, 8))
    B_pad = _round_up(B, bb)
    grid = (B_pad // bb,)

    # Lane-dense bf16 input (torch .float() then one bf16 cast for the MXU),
    # zero-padded to (B_pad, 128).
    x_p = jnp.zeros((B_pad, D_PAD), jnp.bfloat16)
    x_p = x_p.at[:B, :n_input].set(x.astype(jnp.float32).astype(jnp.bfloat16))

    cparams = pltpu.CompilerParams(dimension_semantics=("parallel",))
    out_shape = jax.ShapeDtypeStruct((B_pad, D_PAD), jnp.float32)
    x_spec = pl.BlockSpec((bb, D_PAD), lambda i: (i, 0))
    w_spec = pl.BlockSpec((N_LAYERS, D_PAD, D_PAD), lambda i: (0, 0, 0))
    b_spec = pl.BlockSpec((N_LAYERS, 1, D_PAD), lambda i: (0, 0, 0))
    out_spec = pl.BlockSpec((bb, D_PAD), lambda i: (i, 0))

    if action is None:
        kernel = functools.partial(_mlp_q_kernel, act_dtype=act_dtype)
        q_pad = pl.pallas_call(
            kernel,
            out_shape=out_shape,
            grid=grid,
            in_specs=[x_spec, w_spec, b_spec],
            out_specs=out_spec,
            compiler_params=cparams,
        )(x_p, w_slab, b_slab)
        return q_pad[:B, :n_output]

    # action path: gather fused into the kernel, lane-dense output slab.
    a = jnp.asarray(action, jnp.int32).reshape(B, 1)
    a_p = jnp.zeros((B_pad, 1), jnp.int32).at[:B].set(a)
    kernel = functools.partial(_mlp_qa_kernel, act_dtype=act_dtype)
    qa_pad = pl.pallas_call(
        kernel,
        out_shape=out_shape,
        grid=grid,
        in_specs=[x_spec, pl.BlockSpec((bb, 1), lambda i: (i, 0)), w_spec, b_spec],
        out_specs=out_spec,
        compiler_params=cparams,
    )(x_p, a_p, w_slab, b_slab)
    return jnp.squeeze(qa_pad[:B, 0])                        # torch .squeeze()


# ----------------------------------------------------------------------------
# Deterministic parameter init (mirrors Network_Q2.__init__)
# ----------------------------------------------------------------------------
def _xavier_uniform(key, shape, gain):
    fan_out, fan_in = shape  # PyTorch Linear weight is (out, in)
    bound = gain * math.sqrt(6.0 / (fan_in + fan_out))
    return jax.random.uniform(key, shape, jnp.float32, -bound, bound)


def _linear_bias(key, fan_in, fan_out):
    bound = 1.0 / math.sqrt(fan_in)
    return jax.random.uniform(key, (fan_out,), jnp.float32, -bound, bound)


def init_params(key, n_input, n_features, n_output):
    relu_gain = math.sqrt(2.0)   # nn.init.calculate_gain('relu')
    lin_gain = 1.0               # nn.init.calculate_gain('linear')
    dims = [n_input] + [n_features] * 4 + [n_output]
    gains = [relu_gain] * 4 + [lin_gain]
    params = {}
    for i in range(N_LAYERS):
        key, kw, kb = jax.random.split(key, 3)
        fan_in, fan_out = dims[i], dims[i + 1]
        params[f"w{i+1}"] = _xavier_uniform(kw, (fan_out, fan_in), gains[i])
        params[f"b{i+1}"] = _linear_bias(kb, fan_in, fan_out)
    return params


# ----------------------------------------------------------------------------
# Pure-JAX reference (identical bf16-matmul / f32-accumulate recipe as the kernel)
# ----------------------------------------------------------------------------
def _reference_forward(state, params, act_dtype):
    x = jnp.squeeze(state, axis=1).astype(jnp.float32)
    h = x.astype(jnp.bfloat16)
    zero = jnp.asarray(0, act_dtype)
    for i in range(1, N_LAYERS):
        w = jnp.asarray(params[f"w{i}"], jnp.float32).T.astype(jnp.bfloat16)
        b = jnp.asarray(params[f"b{i}"], jnp.float32).astype(act_dtype)
        acc = jnp.dot(h, w, preferred_element_type=jnp.float32)
        h = jnp.maximum(acc.astype(act_dtype) + b, zero).astype(jnp.bfloat16)
    w = jnp.asarray(params[f"w{N_LAYERS}"], jnp.float32).T.astype(jnp.bfloat16)
    b = jnp.asarray(params[f"b{N_LAYERS}"], jnp.float32)
    return jnp.dot(h, w, preferred_element_type=jnp.float32) + b


if __name__ == "__main__":
    key = jax.random.PRNGKey(0)

    # Small shapes consistent with the module: input_shape=(1, n_input), output_shape=(n_output,)
    batch = 8
    n_input = 6
    n_features = 32
    n_output = 5

    kp, ks, ka, ks2, ka2 = jax.random.split(key, 5)
    act_dtype = _act_dtype_for_device()
    params = init_params(kp, n_input, n_features, n_output)
    packed = pack_params(params, n_input, n_features, n_output)   # one-time packing

    state = jax.random.normal(ks, (batch, 1, n_input), jnp.float32)
    action = jax.random.randint(ka, (batch, 1), 0, n_output)

    # action=None path (returns full q)
    q = jax.block_until_ready(
        network_q2_forward(state, packed, n_input=n_input, n_output=n_output))
    # action path (fused gather + squeeze)
    q_acted = jax.block_until_ready(
        network_q2_forward(state, packed, n_input=n_input, n_output=n_output,
                           action=action))

    q_ref = _reference_forward(state, params, act_dtype)
    assert q.shape == (batch, n_output)
    assert q_acted.shape == (batch,)
    assert jnp.allclose(q, q_ref, atol=5e-3, rtol=5e-3)
    assert jnp.allclose(
        q_acted, jnp.squeeze(jnp.take_along_axis(q_ref, action, axis=1)),
        atol=5e-3, rtol=5e-3)

    # Larger ragged batch: exercises the cdiv grid + batch padding + parallel sharding.
    big_b = 600                                   # not a multiple of BLOCK_B on purpose
    big_state = jax.random.normal(ks2, (big_b, 1, n_input), jnp.float32)
    big_action = jax.random.randint(ka2, (big_b, 1), 0, n_output)
    q_big = jax.block_until_ready(
        network_q2_forward(big_state, packed, n_input=n_input, n_output=n_output))
    qa_big = jax.block_until_ready(
        network_q2_forward(big_state, packed, n_input=n_input, n_output=n_output,
                           action=big_action))
    q_big_ref = _reference_forward(big_state, params, act_dtype)
    assert q_big.shape == (big_b, n_output)
    assert qa_big.shape == (big_b,)
    assert jnp.allclose(q_big, q_big_ref, atol=5e-3, rtol=5e-3)
    assert jnp.allclose(
        qa_big, jnp.squeeze(jnp.take_along_axis(q_big_ref, big_action, axis=1)),
        atol=5e-3, rtol=5e-3)

    print("KERNEL_OK")
</pallas_src>

<mosaic_0001>
module attributes {stable_mosaic.version = 11 : i64} {
  func.func @_mlp_q_kernel(%arg0: i32, %arg1: memref<8x128xbf16, #tpu.memory_space<vmem>>, %arg2: memref<5x128x128xbf16, #tpu.memory_space<vmem>>, %arg3: memref<5x1x128xf32, #tpu.memory_space<vmem>>, %arg4: memref<8x128xf32, #tpu.memory_space<vmem>>) attributes {dimension_semantics = [#tpu.dimension_semantics<parallel>], iteration_bounds = array<i64: 1>, scalar_prefetch = 0 : i64, scratch_operands = 0 : i64, tpu.core_type = #tpu.core_type<tc>, window_params = [{transform_indices = @transform_0, window_bounds = array<i64: 8, 128>}, {pipeline_mode = #tpu.pipeline_mode<synchronous>, transform_indices = @transform_1, window_bounds = array<i64: 5, 128, 128>}, {pipeline_mode = #tpu.pipeline_mode<synchronous>, transform_indices = @transform_2, window_bounds = array<i64: 5, 1, 128>}, {transform_indices = @transform_3, window_bounds = array<i64: 8, 128>}]} {
    %c0 = arith.constant 0 : index
    %c0_0 = arith.constant 0 : index
    %0 = vector.load %arg1[%c0, %c0_0] : memref<8x128xbf16, #tpu.memory_space<vmem>>, vector<8x128xbf16>
    %c0_1 = arith.constant 0 : index
    %c0_2 = arith.constant 0 : index
    %c0_3 = arith.constant 0 : index
    %1 = vector.load %arg2[%c0_1, %c0_2, %c0_3] : memref<5x128x128xbf16, #tpu.memory_space<vmem>>, vector<1x128x128xbf16>
    %2 = vector.shape_cast %1 : vector<1x128x128xbf16> to vector<128x128xbf16>
    %cst = arith.constant dense<0.000000e+00> : vector<8x128xf32>
    %3 = tpu.matmul %0, %2, %cst {dimension_numbers = #tpu.dot_dimension_numbers<[1], [0], [0], [1], [0, 0, 1, 1], [], []>} : vector<8x128xbf16>, vector<128x128xbf16>, vector<8x128xf32> -> vector<8x128xf32>
    %c0_4 = arith.constant 0 : index
    %c0_5 = arith.constant 0 : index
    %c0_6 = arith.constant 0 : index
    %4 = vector.load %arg3[%c0_4, %c0_5, %c0_6] : memref<5x1x128xf32, #tpu.memory_space<vmem>>, vector<1x1x128xf32>
    %5 = vector.shape_cast %4 : vector<1x1x128xf32> to vector<1x128xf32>
    %6 = vector.broadcast %5 : vector<1x128xf32> to vector<8x128xf32>
    %7 = arith.addf %3, %6 : vector<8x128xf32>
    %cst_7 = arith.constant 0.000000e+00 : f32
    %8 = vector.broadcast %cst_7 : f32 to vector<8x128xf32>
    %9 = arith.maximumf %7, %8 : vector<8x128xf32>
    %10 = arith.truncf %9 : vector<8x128xf32> to vector<8x128xbf16>
    %c1 = arith.constant 1 : index
    %c0_8 = arith.constant 0 : index
    %c0_9 = arith.constant 0 : index
    %11 = vector.load %arg2[%c1, %c0_8, %c0_9] : memref<5x128x128xbf16, #tpu.memory_space<vmem>>, vector<1x128x128xbf16>
    %12 = vector.shape_cast %11 : vector<1x128x128xbf16> to vector<128x128xbf16>
    %cst_10 = arith.constant dense<0.000000e+00> : vector<8x128xf32>
    %13 = tpu.matmul %10, %12, %cst_10 {dimension_numbers = #tpu.dot_dimension_numbers<[1], [0], [0], [1], [0, 0, 1, 1], [], []>} : vector<8x128xbf16>, vector<128x128xbf16>, vector<8x128xf32> -> vector<8x128xf32>
    %c1_11 = arith.constant 1 : index
    %c0_12 = arith.constant 0 : index
    %c0_13 = arith.constant 0 : index
    %14 = vector.load %arg3[%c1_11, %c0_12, %c0_13] : memref<5x1x128xf32, #tpu.memory_space<vmem>>, vector<1x1x128xf32>
    %15 = vector.shape_cast %14 : vector<1x1x128xf32> to vector<1x128xf32>
    %16 = vector.broadcast %15 : vector<1x128xf32> to vector<8x128xf32>
    %17 = arith.addf %13, %16 : vector<8x128xf32>
    %cst_14 = arith.constant 0.000000e+00 : f32
    %18 = vector.broadcast %cst_14 : f32 to vector<8x128xf32>
    %19 = arith.maximumf %17, %18 : vector<8x128xf32>
    %20 = arith.truncf %19 : vector<8x128xf32> to vector<8x128xbf16>
    %c2 = arith.constant 2 : index
    %c0_15 = arith.constant 0 : index
    %c0_16 = arith.constant 0 : index
    %21 = vector.load %arg2[%c2, %c0_15, %c0_16] : memref<5x128x128xbf16, #tpu.memory_space<vmem>>, vector<1x128x128xbf16>
    %22 = vector.shape_cast %21 : vector<1x128x128xbf16> to vector<128x128xbf16>
    %cst_17 = arith.constant dense<0.000000e+00> : vector<8x128xf32>
    %23 = tpu.matmul %20, %22, %cst_17 {dimension_numbers = #tpu.dot_dimension_numbers<[1], [0], [0], [1], [0, 0, 1, 1], [], []>} : vector<8x128xbf16>, vector<128x128xbf16>, vector<8x128xf32> -> vector<8x128xf32>
    %c2_18 = arith.constant 2 : index
    %c0_19 = arith.constant 0 : index
    %c0_20 = arith.constant 0 : index
    %24 = vector.load %arg3[%c2_18, %c0_19, %c0_20] : memref<5x1x128xf32, #tpu.memory_space<vmem>>, vector<1x1x128xf32>
    %25 = vector.shape_cast %24 : vector<1x1x128xf32> to vector<1x128xf32>
    %26 = vector.broadcast %25 : vector<1x128xf32> to vector<8x128xf32>
    %27 = arith.addf %23, %26 : vector<8x128xf32>
    %cst_21 = arith.constant 0.000000e+00 : f32
    %28 = vector.broadcast %cst_21 : f32 to vector<8x128xf32>
    %29 = arith.maximumf %27, %28 : vector<8x128xf32>
    %30 = arith.truncf %29 : vector<8x128xf32> to vector<8x128xbf16>
    %c3 = arith.constant 3 : index
    %c0_22 = arith.constant 0 : index
    %c0_23 = arith.constant 0 : index
    %31 = vector.load %arg2[%c3, %c0_22, %c0_23] : memref<5x128x128xbf16, #tpu.memory_space<vmem>>, vector<1x128x128xbf16>
    %32 = vector.shape_cast %31 : vector<1x128x128xbf16> to vector<128x128xbf16>
    %cst_24 = arith.constant dense<0.000000e+00> : vector<8x128xf32>
    %33 = tpu.matmul %30, %32, %cst_24 {dimension_numbers = #tpu.dot_dimension_numbers<[1], [0], [0], [1], [0, 0, 1, 1], [], []>} : vector<8x128xbf16>, vector<128x128xbf16>, vector<8x128xf32> -> vector<8x128xf32>
    %c3_25 = arith.constant 3 : index
    %c0_26 = arith.constant 0 : index
    %c0_27 = arith.constant 0 : index
    %34 = vector.load %arg3[%c3_25, %c0_26, %c0_27] : memref<5x1x128xf32, #tpu.memory_space<vmem>>, vector<1x1x128xf32>
    %35 = vector.shape_cast %34 : vector<1x1x128xf32> to vector<1x128xf32>
    %36 = vector.broadcast %35 : vector<1x128xf32> to vector<8x128xf32>
    %37 = arith.addf %33, %36 : vector<8x128xf32>
    %cst_28 = arith.constant 0.000000e+00 : f32
    %38 = vector.broadcast %cst_28 : f32 to vector<8x128xf32>
    %39 = arith.maximumf %37, %38 : vector<8x128xf32>
    %40 = arith.truncf %39 : vector<8x128xf32> to vector<8x128xbf16>
    %c4 = arith.constant 4 : index
    %c0_29 = arith.constant 0 : index
    %c0_30 = arith.constant 0 : index
    %41 = vector.load %arg2[%c4, %c0_29, %c0_30] : memref<5x128x128xbf16, #tpu.memory_space<vmem>>, vector<1x128x128xbf16>
    %42 = vector.shape_cast %41 : vector<1x128x128xbf16> to vector<128x128xbf16>
    %cst_31 = arith.constant dense<0.000000e+00> : vector<8x128xf32>
    %43 = tpu.matmul %40, %42, %cst_31 {dimension_numbers = #tpu.dot_dimension_numbers<[1], [0], [0], [1], [0, 0, 1, 1], [], []>} : vector<8x128xbf16>, vector<128x128xbf16>, vector<8x128xf32> -> vector<8x128xf32>
    %c4_32 = arith.constant 4 : index
    %c0_33 = arith.constant 0 : index
    %c0_34 = arith.constant 0 : index
    %44 = vector.load %arg3[%c4_32, %c0_33, %c0_34] : memref<5x1x128xf32, #tpu.memory_space<vmem>>, vector<1x1x128xf32>
    %45 = vector.shape_cast %44 : vector<1x1x128xf32> to vector<1x128xf32>
    %46 = vector.broadcast %45 : vector<1x128xf32> to vector<8x128xf32>
    %47 = arith.addf %43, %46 : vector<8x128xf32>
    %c0_35 = arith.constant 0 : index
    %c0_36 = arith.constant 0 : index
    %48 = vector.load %arg4[%c0_35, %c0_36] : memref<8x128xf32, #tpu.memory_space<vmem>>, vector<8x128xf32>
    tpu.vector_store %arg4[%c0_35, %c0_36], %47 {strides = array<i32>} : memref<8x128xf32, #tpu.memory_space<vmem>>, vector<8x128xf32>,
    return
  }
  func.func @transform_0(%arg0: i32) -> (i32, i32) {
    %c0_i32 = arith.constant 0 : i32
    %c0_i32_0 = arith.constant 0 : i32
    return %arg0, %c0_i32 : i32, i32
  }
  func.func @transform_1(%arg0: i32) -> (i32, i32, i32) {
    %c0_i32 = arith.constant 0 : i32
    %c0_i32_0 = arith.constant 0 : i32
    %c0_i32_1 = arith.constant 0 : i32
    %c0_i32_2 = arith.constant 0 : i32
    return %c0_i32, %c0_i32_0, %c0_i32_1 : i32, i32, i32
  }
  func.func @transform_2(%arg0: i32) -> (i32, i32, i32) {
    %c0_i32 = arith.constant 0 : i32
    %c0_i32_0 = arith.constant 0 : i32
    %c0_i32_1 = arith.constant 0 : i32
    %c0_i32_2 = arith.constant 0 : i32
    return %c0_i32, %c0_i32_0, %c0_i32_1 : i32, i32, i32
  }
  func.func @transform_3(%arg0: i32) -> (i32, i32) {
    %c0_i32 = arith.constant 0 : i32
    %c0_i32_0 = arith.constant 0 : i32
    return %arg0, %c0_i32 : i32, i32
  }
}

</mosaic_0001>

<bundles_post_ra>
// kernel: tpu_custom_call.1
= control target key start
LH: loop header
LB: loop body
LE: loop exit
PB: predicated region body
PF: predicated region fallthrough
CT: control target
= control target key end

     0   :  { %8 = vsyncpa [#allocation3], 0  ;;  %s1079_s0 = inlined_call_operand.hbm [shape: bf16[8,128], index: 0, kind: input, shape index: {}]   ;;  %s1080_s1 = inlined_call_operand.hbm [shape: bf16[5,128,128], index: 1, kind: input, shape index: {}]   ;;  %s1081_s2 = inlined_call_operand.vmem [shape: f32[5,1,128], index: 2, kind: input, shape index: {}]   ;;  %s1082_s3 = inlined_call_operand.hbm [shape: f32[8,128], index: 3, kind: output, shape index: {}]  }
   0x1   :  { %9 = vsyncpa [#allocation6], 0 }
   0x2   :  { %10 = vsyncpa [#allocation4], 0  ;;  %s944_s12 = smov [#allocation2]   ;;  %s945_s14 = smov [#allocation5]  }
   0x3   :  { %s17_s13 = sshll.u32 %s944_s12, 4  ;;  %s26_s15 = sshll.u32 %s945_s14, 4  ;;  %s18_s13 = int_to_ptr.vmem [resolvable:$true] %s17_s13  ;;  %s971_s15 = int_to_ptr.vmem [resolvable:$true] %s26_s15 }
   0x4   :  { %s872_s18 = scalar_lea.hbm %s1079_s0, 64 }
   0x5   :  { %p873_p0 = scmp.ne.s32.totalorder %s1079_s0, %s872_s18  ;;  %p876_p1 = scmp.lt.u32.totalorder %s872_s18, %s1079_s0 }
   0x7   :  { %p878_p2 = pnand %p876_p1, %p873_p0 }
   0x9   :  { %881 = shalt.err (!%p878_p2)
}
   0xa   :  { %s882_s23 = scalar_lea.vmem %s18_s13, 64  ;;  %p887_p4 = scmp.lt.s32.totalorder %s18_s13, %s18_s13 }
   0xb   :  { %p883_p3 = scmp.ne.s32.totalorder %s18_s13, %s882_s23  ;;  %p888_p5 = scmp.lt.s32.totalorder %s882_s23, %s882_s23 }
   0xd   :  { %p889_p6 = por %p888_p5, %p887_p4 }
   0xf   :  { %p890_p7 = pnand %p889_p6, %p883_p3 }
  0x11   :  { %893 = shalt.err (!%p890_p7)
}
  0x12   :  { %20 = dma.hbm_to_vmem [thread:$0]  %s1079_s0, 64, %s18_s13, [#allocation3]  }
  0x13   :  { %s894_s28 = scalar_lea.hbm %s1080_s1, 5120 }
  0x14   :  { %p895_p8 = scmp.ne.s32.totalorder %s1080_s1, %s894_s28  ;;  %p898_p9 = scmp.lt.u32.totalorder %s894_s28, %s1080_s1 }
  0x16   :  { %p900_p10 = pnand %p898_p9, %p895_p8 }
  0x18   :  { %903 = shalt.err (!%p900_p10)
}
  0x19   :  { %s904_s6 = scalar_lea.vmem %s971_s15, 5120  ;;  %p909_p12 = scmp.lt.s32.totalorder %s971_s15, %s971_s15 }
  0x1a   :  { %p905_p11 = scmp.ne.s32.totalorder %s971_s15, %s904_s6  ;;  %p910_p13 = scmp.lt.s32.totalorder %s904_s6, %s904_s6 }
  0x1c   :  { %p911_p0 = por %p910_p13, %p909_p12 }
  0x1e   :  { %p912_p1 = pnand %p911_p0, %p905_p11 }
  0x20   :  { %915 = shalt.err (!%p912_p1)
}
  0x21   :  { %s946_s0 = smov 64   ;;  %s947_s7 = smov 4  }
  0x22   :  { %32 = dma.hbm_to_vmem [thread:$0]  %s1080_s1, 5120, %s971_s15, [#allocation6], %s946_s0, %s946_s0, %s947_s7  }
  0x23   :  { %938 = dma.done.wait [#allocation3], 64  }
  0x24   :  { %939 = vsyncadd [#allocation3], 4294967232 }
  0x25   :  { %940 = dma.done.wait [#allocation6], 5120  }
  0x26   :  { %941 = vsyncadd [#allocation6], 4294962176  ;;  %v948_v0 = vmov 0.0   ;;  %vm949_vm0 = vmmov 0   ;;  %v832_v1 = vld [vmem:[#allocation5] sm:$0xff]   ;;  %v833_v2 = vld [vmem:[#allocation5 + $0x8] sm:$0xff]  }
  0x27   :  { %725 = vmatprep.subr.bf16.mxu0 %v948_v0  ;;  %741 = vmatprep.mubr.msk.bf16.mxu0 %vm949_vm0, %v948_v0  ;;  %v834_v3 = vld [vmem:[#allocation5 + $0x10] sm:$0xff]   ;;  %v840_v4 = vld [vmem:[#allocation5 + $0x40] sm:$0xff]   ;;  %v835_v5 = vld [vmem:[#allocation5 + $0x18] sm:$0xff]   ;;  %s950_s19 = smov [#allocation7]  }
  0x28   :  { %745 = vmatprep.subr.bf16.mxu1 %v948_v0  ;;  %761 = vmatprep.mubr.msk.bf16.mxu1 %vm949_vm0, %v948_v0  ;;  %v841_v6 = vld [vmem:[#allocation5 + $0x48] sm:$0xff]   ;;  %v836_v7 = vld [vmem:[#allocation5 + $0x20] sm:$0xff]   ;;  %v842_v8 = vld [vmem:[#allocation5 + $0x50] sm:$0xff]   ;;  %s621_s20 = sshll.u32 %s950_s19, 4  ;;  %s622_s20 = int_to_ptr.vmem [resolvable:$true] %s621_s20 }
  0x29   :  { %726 = vmatpush3.bf16.msra.mxu0 %v832_v1  ;;  %746 = vmatpush3.bf16.msra.mxu1 %v840_v4  ;;  %v837_v9 = vld [vmem:[#allocation5 + $0x28] sm:$0xff]   ;;  %v843_v10 = vld [vmem:[#allocation5 + $0x58] sm:$0xff]   ;;  %v838_v11 = vld [vmem:[#allocation5 + $0x30] sm:$0xff]   ;;  %s916_s21 = scalar_lea.vmem %s622_s20, 128  ;;  %p921_p3 = scmp.lt.s32.totalorder %s622_s20, %s622_s20 }
  0x2a   :  { %727 = vmatprep.subr.bf16.mxu0 %v948_v0  ;;  %747 = vmatprep.subr.bf16.mxu1 %v948_v0  ;;  %v844_v12 = vld [vmem:[#allocation5 + $0x60] sm:$0xff]   ;;  %v839_v13 = vld [vmem:[#allocation5 + $0x38] sm:$0xff]   ;;  %v845_v14 = vld [vmem:[#allocation5 + $0x68] sm:$0xff]   ;;  %p917_p2 = scmp.ne.s32.totalorder %s622_s20, %s916_s21  ;;  %p922_p4 = scmp.lt.s32.totalorder %s916_s21, %s916_s21 }
  0x2b   :  { %v42_v15 = vld [vmem:[#allocation2] sm:$0xf]  ;;  %v846_v16 = vld [vmem:[#allocation5 + $0x70] sm:$0xff]   ;;  %v848_v18 = vld [vmem:[#allocation5 + $0x80] sm:$0xff]  }
  0x2c   :  { %v847_v17 = vld [vmem:[#allocation5 + $0x78] sm:$0xff]   ;;  %v849_v19 = vld [vmem:[#allocation5 + $0x88] sm:$0xff]   ;;  %v850_v20 = vld [vmem:[#allocation5 + $0x90] sm:$0xff]   ;;  %p923_p5 = por %p922_p4, %p921_p3 }
  0x2d   :  { %728 = vmatpush3.bf16.msra.mxu0 %v833_v2  ;;  %748 = vmatpush3.bf16.msra.mxu1 %v841_v6  ;;  %v851_v21 = vld [vmem:[#allocation5 + $0x98] sm:$0xff]   ;;  %v852_v22 = vld [vmem:[#allocation5 + $0xa0] sm:$0xff]   ;;  %v853_v23 = vld [vmem:[#allocation5 + $0xa8] sm:$0xff]  }
  0x2e   :  { %729 = vmatprep.subr.bf16.mxu0 %v948_v0  ;;  %749 = vmatprep.subr.bf16.mxu1 %v948_v0  ;;  %v631_v24 = vld [vmem:[%s1081_s2] ss:$0 sm:$0xff]  ;;  %v855_v33 = vld [vmem:[#allocation5 + $0xb8] sm:$0xff]   ;;  %v856_v34 = vld [vmem:[#allocation5 + $0xc0] sm:$0xff]   ;;  %p924_p6 = pnand %p923_p5, %p917_p2 }
  0x2f   :  { %v854_v32 = vld [vmem:[#allocation5 + $0xb0] sm:$0xff]   ;;  %v857_v35 = vld [vmem:[#allocation5 + $0xc8] sm:$0xff]   ;;  %v859_v37 = vld [vmem:[#allocation5 + $0xd8] sm:$0xff]  }
  0x30   :  { %v858_v36 = vld [vmem:[#allocation5 + $0xd0] sm:$0xff]   ;;  %v860_v38 = vld [vmem:[#allocation5 + $0xe0] sm:$0xff]   ;;  %v861_v39 = vld [vmem:[#allocation5 + $0xe8] sm:$0xff]  }
  0x31   :  { %730 = vmatpush3.bf16.msra.mxu0 %v834_v3  ;;  %750 = vmatpush3.bf16.msra.mxu1 %v842_v8  ;;  %v641_v40 = vld [vmem:[%s1081_s2 + $0x1] ss:$0 sm:$0xff]  ;;  %v863_v49 = vld [vmem:[#allocation5 + $0xf8] sm:$0xff]   ;;  %v864_v50 = vld [vmem:[#allocation5 + $0x100] sm:$0xff]  }
  0x32   :  { %731 = vmatprep.subr.bf16.mxu0 %v948_v0  ;;  %751 = vmatprep.subr.bf16.mxu1 %v948_v0  ;;  %v862_v48 = vld [vmem:[#allocation5 + $0xf0] sm:$0xff]   ;;  %v865_v51 = vld [vmem:[#allocation5 + $0x108] sm:$0xff]   ;;  %v867_v53 = vld [vmem:[#allocation5 + $0x118] sm:$0xff]  }
  0x33   :  { %v866_v52 = vld [vmem:[#allocation5 + $0x110] sm:$0xff]   ;;  %v868_v54 = vld [vmem:[#allocation5 + $0x120] sm:$0xff]   ;;  %v869_v55 = vld [vmem:[#allocation5 + $0x128] sm:$0xff]  }
  0x34   :  { %v651_v56 = vld [vmem:[%s1081_s2 + $0x2] ss:$0 sm:$0xff]  ;;  %v871_v2 = vld [vmem:[#allocation5 + $0x138] sm:$0xff]   ;;  %v661_v3 = vld [vmem:[%s1081_s2 + $0x3] ss:$0 sm:$0xff] }
  0x35   :  { %732 = vmatpush3.bf16.msra.mxu0 %v835_v5  ;;  %752 = vmatpush3.bf16.msra.mxu1 %v843_v10  ;;  %v870_v1 = vld [vmem:[#allocation5 + $0x130] sm:$0xff]  }
  0x36   :  { %733 = vmatprep.subr.bf16.mxu0 %v948_v0  ;;  %753 = vmatprep.subr.bf16.mxu1 %v948_v0 }
  0x39   :  { %734 = vmatpush3.bf16.msra.mxu0 %v836_v7  ;;  %754 = vmatpush3.bf16.msra.mxu1 %v844_v12 }
  0x3a   :  { %735 = vmatprep.subr.bf16.mxu0 %v948_v0  ;;  %755 = vmatprep.subr.bf16.mxu1 %v948_v0 }
  0x3d   :  { %736 = vmatpush3.bf16.msra.mxu0 %v837_v9  ;;  %756 = vmatpush3.bf16.msra.mxu1 %v845_v14 }
  0x3e   :  { %737 = vmatprep.subr.bf16.mxu0 %v948_v0  ;;  %757 = vmatprep.subr.bf16.mxu1 %v948_v0 }
  0x41   :  { %738 = vmatpush3.bf16.msra.mxu0 %v838_v11  ;;  %758 = vmatpush3.bf16.msra.mxu1 %v846_v16  ;;  %v671_v11 = vld [vmem:[%s1081_s2 + $0x4] ss:$0 sm:$0xff] }
  0x42   :  { %739 = vmatprep.subr.bf16.mxu0 %v948_v0  ;;  %759 = vmatprep.subr.bf16.mxu1 %v948_v0 }
  0x45   :  { %740 = vmatpush3.bf16.msra.mxu0 %v839_v13  ;;  %760 = vmatpush3.bf16.msra.mxu1 %v847_v17 }
  0x46   :  { %765 = vmatprep.subr.bf16.mxu0 %v948_v0  ;;  %785 = vmatprep.subr.bf16.mxu1 %v948_v0 }
  0x48   :  { %742 = vmatmul.mubr.bf16.vlgmr.msra.gmra.mrb[0].mxu0 %v42_v15 }
  0x49   :  { %781 = vmatprep.mubr.msk.bf16.mxu0 %vm949_vm0, %v948_v0  ;;  %766 = vmatpush3.bf16.msra.mxu0 %v848_v18 }
  0x4a   :  { %767 = vmatprep.subr.bf16.mxu0 %v948_v0 }
  0x4d   :  { %768 = vmatpush3.bf16.msra.mxu0 %v849_v19 }
  0x4e   :  { %769 = vmatprep.subr.bf16.mxu0 %v948_v0 }
  0x51   :  { %770 = vmatpush3.bf16.msra.mxu0 %v850_v20 }
  0x52   :  { %771 = vmatprep.subr.bf16.mxu0 %v948_v0 }
  0x55   :  { %772 = vmatpush3.bf16.msra.mxu0 %v851_v21 }
  0x56   :  { %773 = vmatprep.subr.bf16.mxu0 %v948_v0 }
  0x59   :  { %774 = vmatpush3.bf16.msra.mxu0 %v852_v22 }
  0x5a   :  { %775 = vmatprep.subr.bf16.mxu0 %v948_v0 }
  0x5d   :  { %776 = vmatpush3.bf16.msra.mxu0 %v853_v23 }
  0x5e   :  { %777 = vmatprep.subr.bf16.mxu0 %v948_v0 }
  0x61   :  { %778 = vmatpush3.bf16.msra.mxu0 %v854_v32 }
  0x62   :  { %779 = vmatprep.subr.bf16.mxu0 %v948_v0 }
  0x65   :  { %780 = vmatpush3.bf16.msra.mxu0 %v855_v33 }
  0x66   :  { %805 = vmatprep.subr.bf16.mxu0 %v948_v0 }
 0x11b   :  { %v148_v25 = vpop.f32.mrb[0].mxu0 }
 0x11c   :  { %v149_v26 = vadd.f32 %v631_v24, %v148_v25  ;;  %v743_v27 = vpop.f32.mrb[1].mxu0 }
 0x11d   :  { %v151_v28 = vpop.f32.mrb[2].mxu0 }
 0x11e   :  { %v154_v29 = vmax.f32 %v149_v26, 0.0  ;;  %v744_v30 = vpop.f32.mrb[3].mxu0 }
 0x120   :  { %v155_v31 = vpack.c.bf16 %v154_v29, %v154_v29 }
 0x122   :  { %762 = vmatmul.mubr.bf16.vlgmr.msra.gmra.mrb[0].mxu1 %v155_v31 }
 0x123   :  { %801 = vmatprep.mubr.msk.bf16.mxu1 %vm949_vm0, %v948_v0  ;;  %786 = vmatpush3.bf16.msra.mxu1 %v856_v34 }
 0x124   :  { %787 = vmatprep.subr.bf16.mxu1 %v948_v0 }
 0x127   :  { %788 = vmatpush3.bf16.msra.mxu1 %v857_v35 }
 0x128   :  { %789 = vmatprep.subr.bf16.mxu1 %v948_v0 }
 0x12b   :  { %790 = vmatpush3.bf16.msra.mxu1 %v858_v36 }
 0x12c   :  { %791 = vmatprep.subr.bf16.mxu1 %v948_v0 }
 0x12f   :  { %792 = vmatpush3.bf16.msra.mxu1 %v859_v37 }
 0x130   :  { %793 = vmatprep.subr.bf16.mxu1 %v948_v0 }
 0x133   :  { %794 = vmatpush3.bf16.msra.mxu1 %v860_v38 }
 0x134   :  { %795 = vmatprep.subr.bf16.mxu1 %v948_v0 }
 0x137   :  { %796 = vmatpush3.bf16.msra.mxu1 %v861_v39 }
 0x138   :  { %797 = vmatprep.subr.bf16.mxu1 %v948_v0 }
 0x13b   :  { %798 = vmatpush3.bf16.msra.mxu1 %v862_v48 }
 0x13c   :  { %799 = vmatprep.subr.bf16.mxu1 %v948_v0 }
 0x13f   :  { %800 = vmatpush3.bf16.msra.mxu1 %v863_v49 }
 0x1f5   :  { %v263_v41 = vpop.f32.mrb[0].mxu1 }
 0x1f6   :  { %v264_v42 = vadd.f32 %v641_v40, %v263_v41  ;;  %v763_v43 = vpop.f32.mrb[1].mxu1 }
 0x1f7   :  { %v266_v44 = vpop.f32.mrb[2].mxu1 }
 0x1f8   :  { %v269_v45 = vmax.f32 %v264_v42, 0.0  ;;  %v764_v46 = vpop.f32.mrb[3].mxu1 }
 0x1fa   :  { %v270_v47 = vpack.c.bf16 %v269_v45, %v269_v45 }
 0x1fc   :  { %782 = vmatmul.mubr.bf16.vlgmr.msra.gmra.mrb[4].mxu0 %v270_v47 }
 0x1fd   :  { %821 = vmatprep.mubr.msk.bf16.mxu0 %vm949_vm0, %v948_v0  ;;  %806 = vmatpush3.bf16.msra.mxu0 %v864_v50 }
 0x1fe   :  { %807 = vmatprep.subr.bf16.mxu0 %v948_v0 }
 0x201   :  { %808 = vmatpush3.bf16.msra.mxu0 %v865_v51 }
 0x202   :  { %809 = vmatprep.subr.bf16.mxu0 %v948_v0 }
 0x205   :  { %810 = vmatpush3.bf16.msra.mxu0 %v866_v52 }
 0x206   :  { %811 = vmatprep.subr.bf16.mxu0 %v948_v0 }
 0x209   :  { %812 = vmatpush3.bf16.msra.mxu0 %v867_v53 }
 0x20a   :  { %813 = vmatprep.subr.bf16.mxu0 %v948_v0 }
 0x20d   :  { %814 = vmatpush3.bf16.msra.mxu0 %v868_v54 }
 0x20e   :  { %815 = vmatprep.subr.bf16.mxu0 %v948_v0 }
 0x211   :  { %816 = vmatpush3.bf16.msra.mxu0 %v869_v55 }
 0x212   :  { %817 = vmatprep.subr.bf16.mxu0 %v948_v0 }
 0x215   :  { %818 = vmatpush3.bf16.msra.mxu0 %v870_v1 }
 0x216   :  { %819 = vmatprep.subr.bf16.mxu0 %v948_v0 }
 0x219   :  { %820 = vmatpush3.bf16.msra.mxu0 %v871_v2 }
 0x2cf   :  { %v378_v57 = vpop.f32.mrb[4].mxu0 }
 0x2d0   :  { %v379_v58 = vadd.f32 %v651_v56, %v378_v57  ;;  %v783_v59 = vpop.f32.mrb[5].mxu0 }
 0x2d1   :  { %v381_v60 = vpop.f32.mrb[6].mxu0 }
 0x2d2   :  { %v384_v61 = vmax.f32 %v379_v58, 0.0  ;;  %v784_v62 = vpop.f32.mrb[7].mxu0 }
 0x2d4   :  { %v385_v63 = vpack.c.bf16 %v384_v61, %v384_v61 }
 0x2d6   :  { %802 = vmatmul.mubr.bf16.vlgmr.msra.gmra.mrb[4].mxu1 %v385_v63 }
 0x3a9   :  { %v493_v4 = vpop.f32.mrb[4].mxu1 }
 0x3aa   :  { %v494_v5 = vadd.f32 %v661_v3, %v493_v4  ;;  %v803_v6 = vpop.f32.mrb[5].mxu1 }
 0x3ab   :  { %v496_v7 = vpop.f32.mrb[6].mxu1 }
 0x3ac   :  { %v499_v8 = vmax.f32 %v494_v5, 0.0  ;;  %v804_v9 = vpop.f32.mrb[7].mxu1 }
 0x3ae   :  { %v500_v10 = vpack.c.bf16 %v499_v8, %v499_v8 }
 0x3b0   :  { %822 = vmatmul.mubr.bf16.vlgmr.msra.gmra.mrb[8].mxu0 %v500_v10 }
 0x483   :  { %v608_v0 = vpop.f32.mrb[8].mxu0 }
 0x484   :  { %v609_v12 = vadd.f32 %v671_v11, %v608_v0  ;;  %v823_v13 = vpop.f32.mrb[9].mxu0 }
 0x485   :  { %v611_v14 = vpop.f32.mrb[10].mxu0 }
 0x486   :  { %614 = vst [vmem:[#allocation7] sm:$0xff] %v609_v12  ;;  %v824_v15 = vpop.f32.mrb[11].mxu0 }
 0x487   :  { %927 = shalt.err (!%p924_p6)
}
 0x488   :  { %s928_s2 = scalar_lea.hbm %s1082_s3, 128 }
 0x489   :  { %p929_p7 = scmp.ne.s32.totalorder %s1082_s3, %s928_s2  ;;  %p932_p8 = scmp.lt.u32.totalorder %s928_s2, %s1082_s3 }
 0x48b   :  { %p934_p9 = pnand %p932_p8, %p929_p7 }
 0x48d   :  { %937 = shalt.err (!%p934_p9)
}
 0x48e   :  { %624 = dma.vmem_to_hbm [thread:$0]  %s622_s20, 128, %s1082_s3, [#allocation4]  }
 0x48f   :  { %942 = dma.done.wait [#allocation4], 128  }
 0x490   :  { %943 = vsyncadd [#allocation4], 4294967168 }
 0x491   :  { %628 = vsyncpa [#allocation3], 1 }
 0x492   :  { %629 = vsyncpa [#allocation6], 1 }
 0x493   :  { %630 = vsyncpa [#allocation4], 1 }

</bundles_post_ra>
